<compile_context>
chip_gen: v7x
topology: tpu7x:2x2x1
jax: 0.10.0
libtpu: 0.0.40
codegen_flags: <defaults>
</compile_context>

<pallas_src>
import functools

import jax
import jax.numpy as jnp
from jax.experimental import pallas as pl
from jax.experimental.pallas import tpu as pltpu


def _round_up(n, m):
    return ((n + m - 1) // m) * m


def perceptron_kernel(x_ref, w_ref, b_ref, o_ref):
    # x_ref: (tb, F) VMEM (stored dtype), w_ref: (1, F) VMEM (stored dtype),
    # b_ref: (1, 1) f32 SMEM, o_ref: (tb, 1) f32 VMEM.
    x = x_ref[...].astype(jnp.float32)   # in-kernel upcast: free on the VPU here
    w = w_ref[...].astype(jnp.float32)   # (1, F) broadcasts over the tb rows
    b = b_ref[0, 0]                      # scalar read from SMEM
    # VPU multiply + XLU lane reduction, f32 accumulation.
    o_ref[...] = (jnp.sum(x * w, axis=-1, keepdims=True) + b).astype(o_ref.dtype)


@functools.partial(jax.jit, static_argnames=("x_tile_budget_bytes",))
def perceptron_forward(x, weight, bias, *, x_tile_budget_bytes=16 * 1024 * 1024):
    """x: (B, F) float array, weight: (1, F) (nn.Linear layout), bias: (1,).

    Returns (B, 1) float32 = x @ weight.T + bias.
    x (and weight) are streamed in their stored dtype; pass bf16 to halve HBM
    traffic (accumulation is always f32).
    """
    B, F = x.shape
    w = weight.reshape(1, F)                     # lane-dense, resident; no transpose
    b = bias.reshape(1, 1).astype(jnp.float32)   # scalar -> SMEM

    x_isz = jnp.dtype(x.dtype).itemsize
    w_isz = jnp.dtype(w.dtype).itemsize
    f_lanes = _round_up(F, 128)                  # minor dim pads to 128 lanes in VMEM

    # Sublane granularity of the streamed dtype (f32: 8, bf16: 16, int8/fp8: 32).
    row_align = max(8, 32 // x_isz)

    # VMEM bytes per tile row: lane-padded x row + lane-padded (tb,1) f32 output
    # row, both double-buffered by the pipeline.
    per_row = 2 * (f_lanes * x_isz + 128 * 4)
    tb = max(row_align, (x_tile_budget_bytes // per_row) // row_align * row_align)
    tb = min(tb, _round_up(B, row_align))        # never tile past the batch
    num_tiles = pl.cdiv(B, tb)

    # Explicit scoped-VMEM limit: budget + resident weight + headroom; at least
    # 32 MiB (raises v5e's 16 MiB default, matches v6e/v7x defaults, <= v7x's
    # 64 MiB physical for the budget used here).
    needed = tb * per_row + 2 * 8 * f_lanes * w_isz + (1 << 20)
    vmem_limit = int(max(32 * 1024 * 1024, needed))

    out = pl.pallas_call(
        perceptron_kernel,
        out_shape=jax.ShapeDtypeStruct((B, 1), jnp.float32),
        grid=(num_tiles,),
        in_specs=[
            pl.BlockSpec((tb, F), lambda i: (i, 0)),            # x tile (ragged tail masked)
            pl.BlockSpec((1, F), lambda i: (0, 0)),             # weight, resident
            pl.BlockSpec(memory_space=pltpu.MemorySpace.SMEM),  # bias scalar
        ],
        out_specs=pl.BlockSpec((tb, 1), lambda i: (i, 0)),
        compiler_params=pltpu.CompilerParams(
            dimension_semantics=("parallel",),   # shards row tiles across v7x's 2 TCs
            vmem_limit_bytes=vmem_limit,
        ),
    )(x, w, b)
    return out


if __name__ == "__main__":
    key = jax.random.PRNGKey(0)
    kx, kw = jax.random.split(key)

    batch = 8
    num_features = 32

    # Deterministic parameter init matching nn.init.normal_(std=0.01) / zeros_.
    weight = 0.01 * jax.random.normal(kw, (1, num_features), dtype=jnp.float32)
    bias = jnp.zeros((1,), dtype=jnp.float32)

    x = jax.random.normal(kx, (batch, num_features), dtype=jnp.float32)

    out = jax.block_until_ready(perceptron_forward(x, weight, bias))

    # Reference check against a plain JAX linear layer.
    ref = x @ weight.T + bias
    assert out.shape == (batch, 1)
    assert jnp.allclose(out, ref, atol=1e-5, rtol=1e-5)

    print("KERNEL_OK")
</pallas_src>

<mosaic_0001>
module attributes {stable_mosaic.version = 11 : i64} {
  func.func @perceptron_kernel(%arg0: i32, %arg1: memref<8x32xf32, #tpu.memory_space<vmem>>, %arg2: memref<1x32xf32, #tpu.memory_space<vmem>>, %arg3: memref<1x1xf32, #tpu.memory_space<smem>>, %arg4: memref<8x1xf32, #tpu.memory_space<vmem>>) attributes {dimension_semantics = [#tpu.dimension_semantics<parallel>], iteration_bounds = array<i64: 1>, scalar_prefetch = 0 : i64, scratch_operands = 0 : i64, tpu.core_type = #tpu.core_type<tc>, window_params = [{transform_indices = @transform_0, window_bounds = array<i64: 8, 32>}, {pipeline_mode = #tpu.pipeline_mode<synchronous>, transform_indices = @transform_1, window_bounds = array<i64: 1, 32>}, {transform_indices = @transform_2, window_bounds = array<i64: 1, 1>}, {transform_indices = @transform_3, window_bounds = array<i64: 8, 1>}]} {
    %c0 = arith.constant 0 : index
    %c0_0 = arith.constant 0 : index
    %0 = vector.load %arg1[%c0, %c0_0] : memref<8x32xf32, #tpu.memory_space<vmem>>, vector<8x32xf32>
    %c0_1 = arith.constant 0 : index
    %c0_2 = arith.constant 0 : index
    %1 = vector.load %arg2[%c0_1, %c0_2] : memref<1x32xf32, #tpu.memory_space<vmem>>, vector<1x32xf32>
    %c0_3 = arith.constant 0 : index
    %c0_4 = arith.constant 0 : index
    %2 = memref.load %arg3[%c0_3, %c0_4] : memref<1x1xf32, #tpu.memory_space<smem>>
    %3 = vector.broadcast %1 : vector<1x32xf32> to vector<8x32xf32>
    %4 = arith.mulf %0, %3 : vector<8x32xf32>
    %cst = arith.constant dense<0.000000e+00> : vector<8xf32>
    %5 = vector.multi_reduction <add>, %4, %cst [1] : vector<8x32xf32> to vector<8xf32>
    %6 = vector.shape_cast %5 : vector<8xf32> to vector<8x1xf32>
    %7 = vector.broadcast %2 : f32 to vector<8x1xf32>
    %8 = arith.addf %6, %7 : vector<8x1xf32>
    %c0_5 = arith.constant 0 : index
    %c0_6 = arith.constant 0 : index
    %9 = vector.load %arg4[%c0_5, %c0_6] : memref<8x1xf32, #tpu.memory_space<vmem>>, vector<8x1xf32>
    tpu.vector_store %arg4[%c0_5, %c0_6], %8 {strides = array<i32>} : memref<8x1xf32, #tpu.memory_space<vmem>>, vector<8x1xf32>,
    return
  }
  func.func @transform_0(%arg0: i32) -> (i32, i32) {
    %c0_i32 = arith.constant 0 : i32
    %c0_i32_0 = arith.constant 0 : i32
    return %arg0, %c0_i32 : i32, i32
  }
  func.func @transform_1(%arg0: i32) -> (i32, i32) {
    %c0_i32 = arith.constant 0 : i32
    %c0_i32_0 = arith.constant 0 : i32
    %c0_i32_1 = arith.constant 0 : i32
    return %c0_i32, %c0_i32_0 : i32, i32
  }
  func.func @transform_2(%arg0: i32) -> (i32, i32) {
    %c0_i32 = arith.constant 0 : i32
    %c0_i32_0 = arith.constant 0 : i32
    %c0_i32_1 = arith.constant 0 : i32
    return %c0_i32, %c0_i32_0 : i32, i32
  }
  func.func @transform_3(%arg0: i32) -> (i32, i32) {
    %c0_i32 = arith.constant 0 : i32
    %c0_i32_0 = arith.constant 0 : i32
    return %arg0, %c0_i32 : i32, i32
  }
}

</mosaic_0001>

<bundles_post_ra>
// kernel: perceptron_forward.1
= control target key start
LH: loop header
LB: loop body
LE: loop exit
PB: predicated region body
PF: predicated region fallthrough
CT: control target
= control target key end

     0   :  { %9 = vsyncpa [#allocation4], 0  ;;  %s76_s12 = smov [#allocation3]   ;;  %s118_s0 = inlined_call_operand.hbm [shape: f32[8,32], index: 0, kind: input, shape index: {}]   ;;  %s119_s1 = inlined_call_operand.vmem [shape: f32[1,32], index: 1, kind: input, shape index: {}]   ;;  %s120_s2 = inlined_call_operand.<no memory space> [shape: f32[1,1], index: 2, kind: input, shape index: {}]   ;;  %s121_s3 = inlined_call_operand.vmem [shape: f32[8,1], index: 3, kind: output, shape index: {}]  }
   0x1   :  { %s16_s13 = sshll.u32 %s76_s12, 4  ;;  %s52_s16 = scalar_lea.hbm %s118_s0, 128  ;;  %s17_s13 = int_to_ptr.vmem [resolvable:$true] %s16_s13 }
   0x2   :  { %p53_p0 = scmp.ne.s32.totalorder %s118_s0, %s52_s16  ;;  %p56_p1 = scmp.lt.u32.totalorder %s52_s16, %s118_s0 }
   0x4   :  { %p58_p2 = pnand %p56_p1, %p53_p0 }
   0x6   :  { %61 = shalt.err (!%p58_p2)
}
   0x7   :  { %s62_s21 = scalar_lea.vmem %s17_s13, 128  ;;  %p67_p4 = scmp.lt.s32.totalorder %s17_s13, %s17_s13 }
   0x8   :  { %p63_p3 = scmp.ne.s32.totalorder %s17_s13, %s62_s21  ;;  %p68_p5 = scmp.lt.s32.totalorder %s62_s21, %s62_s21 }
   0xa   :  { %p69_p6 = por %p68_p5, %p67_p4 }
   0xc   :  { %p70_p7 = pnand %p69_p6, %p63_p3 }
   0xe   :  { %73 = shalt.err (!%p70_p7)
}
   0xf   :  { %19 = dma.hbm_to_vmem [thread:$0]  %s118_s0, 128, %s17_s13, [#allocation4]  }
  0x10   :  { %74 = dma.done.wait [#allocation4], 128  }
  0x11   :  { %75 = vsyncadd [#allocation4], 4294967168  ;;  %v27_v0 = vld [vmem:[#allocation3] sm:$0xff]  ;;  %vm37_vm0 = vcmask 261120   ;;  %v41_v4 = vstv %s120_s2  ;;  %vm43_vm1 = vcmask 7168  }
  0x12   :  { %v50_v1 = vld [vmem:[%s119_s1] ss:$0 sm:$0xff] }
  0x13   :  { %v36_v2 = vmul.f32 %v50_v1, %v27_v0 }
  0x15   :  { %v38_v3 = vsel %vm37_vm0, %v36_v2, 0.0 }
  0x16   :  { %39 = vadd.xlane.f32.xlu0 %v38_v3 }
  0xa3   :  { %v40_v5 = vpop.xlane.xlu0 %39 }
  0xa4   :  { %v42_v6 = vadd.f32 %v41_v4, %v40_v5 }
  0xa6   :  { %44 = vst.msk [vmem:[%s121_s3] sm:$0xff] %vm43_vm1, %v42_v6 }
  0xa7   :  { %49 = vsyncpa [#allocation4], 1 }

</bundles_post_ra>
